<compile_context>
chip_gen: v5e
topology: v5e:2x2
jax: 0.10.0
libtpu: 0.0.40
codegen_flags: <defaults>
</compile_context>

<pallas_src>
import jax
import jax.numpy as jnp
from jax.experimental import pallas as pl
from jax.experimental.pallas import tpu as pltpu


def sle_gate_kernel(xp_ref, wl_ref, bl_ref, wh_ref, bh_ref, g_ref):
    # All batches' gates in one (B, K) @ (K, low_out) matmul.
    y = jnp.dot(xp_ref[...], wl_ref[...],
                preferred_element_type=jnp.float32) + bl_ref[...]
    y = jnp.where(y > 0, y, 0.1 * y)                                  # LeakyReLU(0.1)
    g = jnp.dot(y, wh_ref[...],
                preferred_element_type=jnp.float32) + bh_ref[...]     # 1x1 conv
    g_ref[...] = jax.nn.sigmoid(g)


def sle_scale_kernel(gate_ref, xh_ref, out_ref):
    # gate_ref: (1, low_out, 1)   -- sublane-major gate, lane-splat broadcast
    # xh_ref / out_ref: (1, low_out, T_hw) -- lane-dense spatial tile
    x = xh_ref[...].astype(jnp.float32)
    out_ref[...] = (x * gate_ref[...]).astype(out_ref.dtype)


def _pick_hw_tile(hw, low_out, itemsize, target_bytes=2 * 1024 * 1024):
    # Full HW if it is small, else the largest multiple of 128 lanes keeping one
    # buffer around ~2 MiB (double-buffered in+out fits v5e/v6e/v7x scoped-VMEM
    # defaults, and well under v7x's 64 MiB physical VMEM).
    if hw * low_out * itemsize <= target_bytes:
        return int(hw)
    t = (target_bytes // (low_out * itemsize)) // 128 * 128
    return int(max(128, min(t, hw)))


def skip_layer_excitation(x_low, x_high, w_low, b_low, w_high, b_high):
    B, low_in, Hl, Wl = x_low.shape
    Bh, low_out, Hh, Wh = x_high.shape
    assert B == Bh
    assert Hl % 4 == 0 and Wl % 4 == 0
    # TODO(synk): AdaptiveAvgPool2d with uneven bins (Hl or Wl not divisible by 4)
    # is not handled; the assert above guards it.
    K = low_in * 16

    # AdaptiveAvgPool2d(4): reshape + mean in the wrapper (exact for divisible
    # sizes) -> kernel only sees the tiny (B, K) pooled tensor.
    pooled = x_low.reshape(B, low_in, 4, Hl // 4, 4, Wl // 4).mean(axis=(3, 5))
    xp = pooled.reshape(B, K).astype(jnp.float32)

    w_lowT = w_low.reshape(low_out, K).T.astype(jnp.float32)             # (K, low_out)
    w_highT = w_high.reshape(low_out, low_out).T.astype(jnp.float32)     # (low_out, low_out)
    b_low_row = b_low.reshape(1, low_out).astype(jnp.float32)
    b_high_row = b_high.reshape(1, low_out).astype(jnp.float32)

    # Phase 1: per-(batch, channel) gate, all batches at once, f32 math.
    gate = pl.pallas_call(
        sle_gate_kernel,
        out_shape=jax.ShapeDtypeStruct((B, low_out), jnp.float32),
    )(xp, w_lowT, b_low_row, w_highT, b_high_row)
    gate3 = gate.reshape(B, low_out, 1)   # consumed sublane-major by phase 2

    # Phase 2: mem-bound broadcast multiply over x_high, lane-dense HW tiling.
    HW = Hh * Wh
    xh = x_high.reshape(B, low_out, HW)
    t_hw = _pick_hw_tile(HW, low_out, xh.dtype.itemsize)
    n_hw = pl.cdiv(HW, t_hw)

    out = pl.pallas_call(
        sle_scale_kernel,
        out_shape=jax.ShapeDtypeStruct((B, low_out, HW), x_high.dtype),
        grid_spec=pltpu.PrefetchScalarGridSpec(
            num_scalar_prefetch=0,
            grid=(B, n_hw),
            in_specs=[
                pl.BlockSpec((1, low_out, 1), lambda b, h: (b, 0, 0)),      # gate
                pl.BlockSpec((1, low_out, t_hw), lambda b, h: (b, 0, h)),   # x_high
            ],
            out_specs=pl.BlockSpec((1, low_out, t_hw), lambda b, h: (b, 0, h)),
        ),
        compiler_params=pltpu.CompilerParams(
            dimension_semantics=("parallel", "parallel"),
            vmem_limit_bytes=32 * 1024 * 1024),
        cost_estimate=pl.CostEstimate(
            flops=B * low_out * HW,
            transcendentals=0,
            bytes_accessed=2 * B * low_out * HW * x_high.dtype.itemsize),
    )(gate3, xh)
    return out.reshape(B, low_out, Hh, Wh)


def ref_forward(x_low, x_high, w_low, b_low, w_high, b_high):
    # pure-JAX reference matching the PyTorch module semantics
    B, Cin, H, W = x_low.shape
    low_out = w_low.shape[0]
    pooled = x_low.reshape(B, Cin, 4, H // 4, 4, W // 4).mean(axis=(3, 5))
    y = jnp.einsum('bchw,ochw->bo', pooled, w_low) + b_low
    y = jnp.where(y > 0, y, 0.1 * y)
    g = jnp.einsum('bi,oi->bo', y, w_high.reshape(low_out, low_out)) + b_high
    g = jax.nn.sigmoid(g)
    return x_high * g[:, :, None, None]


if __name__ == "__main__":
    B, low_in, low_out = 2, 4, 8
    Hl = Wl = 16          # low-resolution input spatial size
    Hh = Wh = 16          # high-resolution input spatial size

    key = jax.random.PRNGKey(0)
    k1, k2, k3, k4, k5, k6 = jax.random.split(key, 6)
    x_low = jax.random.normal(k1, (B, low_in, Hl, Wl), jnp.float32)
    x_high = jax.random.normal(k2, (B, low_out, Hh, Wh), jnp.float32)
    # deterministic synthetic parameters (PyTorch conv weight layouts)
    w_low = jax.random.normal(k3, (low_out, low_in, 4, 4), jnp.float32) * 0.1
    b_low = jax.random.normal(k4, (low_out,), jnp.float32) * 0.1
    w_high = jax.random.normal(k5, (low_out, low_out, 1, 1), jnp.float32) * 0.1
    b_high = jax.random.normal(k6, (low_out,), jnp.float32) * 0.1

    out = skip_layer_excitation(x_low, x_high, w_low, b_low, w_high, b_high)
    out = jax.block_until_ready(out)

    ref = ref_forward(x_low, x_high, w_low, b_low, w_high, b_high)
    assert out.shape == (B, low_out, Hh, Wh)
    assert jnp.allclose(out, ref, atol=1e-5, rtol=1e-5), \
        float(jnp.max(jnp.abs(out - ref)))
    print("KERNEL_OK")
</pallas_src>

<mosaic_0001>
module attributes {stable_mosaic.version = 11 : i64} {
  func.func @sle_gate_kernel(%arg0: memref<2x64xf32, #tpu.memory_space<vmem>>, %arg1: memref<64x8xf32, #tpu.memory_space<vmem>>, %arg2: memref<1x8xf32, #tpu.memory_space<vmem>>, %arg3: memref<8x8xf32, #tpu.memory_space<vmem>>, %arg4: memref<1x8xf32, #tpu.memory_space<vmem>>, %arg5: memref<2x8xf32, #tpu.memory_space<vmem>>) attributes {dimension_semantics = [], scalar_prefetch = 0 : i64, scratch_operands = 0 : i64, tpu.core_type = #tpu.core_type<tc>} {
    %c0 = arith.constant 0 : index
    %c0_0 = arith.constant 0 : index
    %0 = vector.load %arg0[%c0, %c0_0] : memref<2x64xf32, #tpu.memory_space<vmem>>, vector<2x64xf32>
    %c0_1 = arith.constant 0 : index
    %c0_2 = arith.constant 0 : index
    %1 = vector.load %arg1[%c0_1, %c0_2] : memref<64x8xf32, #tpu.memory_space<vmem>>, vector<64x8xf32>
    %cst = arith.constant dense<0.000000e+00> : vector<2x8xf32>
    %2 = tpu.matmul %0, %1, %cst {dimension_numbers = #tpu.dot_dimension_numbers<[1], [0], [0], [1], [0, 0, 1, 1], [], []>} : vector<2x64xf32>, vector<64x8xf32>, vector<2x8xf32> -> vector<2x8xf32>
    %c0_3 = arith.constant 0 : index
    %c0_4 = arith.constant 0 : index
    %3 = vector.load %arg2[%c0_3, %c0_4] : memref<1x8xf32, #tpu.memory_space<vmem>>, vector<1x8xf32>
    %4 = vector.broadcast %3 : vector<1x8xf32> to vector<2x8xf32>
    %5 = arith.addf %2, %4 : vector<2x8xf32>
    %cst_5 = arith.constant 0.000000e+00 : f32
    %6 = vector.broadcast %cst_5 : f32 to vector<2x8xf32>
    %7 = arith.cmpf ogt, %5, %6 : vector<2x8xf32>
    %cst_6 = arith.constant 1.000000e-01 : f32
    %8 = vector.broadcast %cst_6 : f32 to vector<2x8xf32>
    %9 = arith.mulf %8, %5 : vector<2x8xf32>
    %10 = arith.select %7, %5, %9 : vector<2x8xi1>, vector<2x8xf32>
    %c0_7 = arith.constant 0 : index
    %c0_8 = arith.constant 0 : index
    %11 = vector.load %arg3[%c0_7, %c0_8] : memref<8x8xf32, #tpu.memory_space<vmem>>, vector<8x8xf32>
    %cst_9 = arith.constant dense<0.000000e+00> : vector<2x8xf32>
    %12 = tpu.matmul %10, %11, %cst_9 {dimension_numbers = #tpu.dot_dimension_numbers<[1], [0], [0], [1], [0, 0, 1, 1], [], []>} : vector<2x8xf32>, vector<8x8xf32>, vector<2x8xf32> -> vector<2x8xf32>
    %c0_10 = arith.constant 0 : index
    %c0_11 = arith.constant 0 : index
    %13 = vector.load %arg4[%c0_10, %c0_11] : memref<1x8xf32, #tpu.memory_space<vmem>>, vector<1x8xf32>
    %14 = vector.broadcast %13 : vector<1x8xf32> to vector<2x8xf32>
    %15 = arith.addf %12, %14 : vector<2x8xf32>
    %16 = arith.negf %15 : vector<2x8xf32>
    %17 = math.exp %16 : vector<2x8xf32>
    %cst_12 = arith.constant 1.000000e+00 : f32
    %18 = vector.broadcast %cst_12 : f32 to vector<2x8xf32>
    %19 = arith.addf %18, %17 : vector<2x8xf32>
    %20 = arith.divf %18, %19 : vector<2x8xf32>
    %c0_13 = arith.constant 0 : index
    %c0_14 = arith.constant 0 : index
    %21 = vector.load %arg5[%c0_13, %c0_14] : memref<2x8xf32, #tpu.memory_space<vmem>>, vector<2x8xf32>
    tpu.vector_store %arg5[%c0_13, %c0_14], %20 {strides = array<i32>} : memref<2x8xf32, #tpu.memory_space<vmem>>, vector<2x8xf32>,
    return
  }
}

</mosaic_0001>

<bundles_post_ra>
// kernel: tpu_custom_call.1
= control target key start
LH: loop header
LB: loop body
LE: loop exit
PB: predicated region body
PF: predicated region fallthrough
CT: control target
= control target key end

     0   :  { %s233_s0 = inlined_call_operand.vmem [shape: f32[2,64], index: 0, kind: input, shape index: {}]   ;;  %s234_s1 = inlined_call_operand.vmem [shape: f32[64,8], index: 1, kind: input, shape index: {}]   ;;  %s235_s2 = inlined_call_operand.vmem [shape: f32[1,8], index: 2, kind: input, shape index: {}]   ;;  %s236_s3 = inlined_call_operand.vmem [shape: f32[8,8], index: 3, kind: input, shape index: {}]   ;;  %s237_s4 = inlined_call_operand.vmem [shape: f32[1,8], index: 4, kind: input, shape index: {}]   ;;  %s238_s5 = inlined_call_operand.hbm [shape: f32[2,8], index: 5, kind: output, shape index: {}]  }
   0x1   :  { %v29_v0 = vld [vmem:[%s234_s1 + $0x38] sm:$0xff]  ;;  %v28_v1 = vld [vmem:[%s234_s1 + $0x30] sm:$0xff]  ;;  %v27_v2 = vld [vmem:[%s234_s1 + $0x28] sm:$0xff] }
   0x2   :  { %46 = vmatpush.msra.mxu0 %v29_v0  ;;  %v26_v3 = vld [vmem:[%s234_s1 + $0x20] sm:$0xff] }
   0x4   :  { %47 = vmatpush.msra.mxu0 %v28_v1 }
   0x5   :  { %10 = vsyncpa [#allocation3], 0  ;;  %v25_v4 = vld [vmem:[%s234_s1 + $0x18] sm:$0xff]  ;;  %v24_v5 = vld [vmem:[%s234_s1 + $0x10] sm:$0xff]  ;;  %vm34_vm0 = vcmask 523264   ;;  %vm66_vm2 = vcmask 64512  }
   0x6   :  { %48 = vmatpush.msra.mxu0 %v27_v2  ;;  %v23_v6 = vld [vmem:[%s234_s1 + $0x8] sm:$0xff]  ;;  %v22_v7 = vld [vmem:[%s234_s1] sm:$0xff]  ;;  %vm109_vm6 = vcmask 58368  }
   0x7   :  { %v21_v8 = vld [vmem:[%s233_s0] sm:$0x3] }
   0x8   :  { %49 = vmatpush.msra.mxu0 %v26_v3  ;;  %v61_v9 = vld [vmem:[%s236_s3] sm:$0xff] }
   0x9   :  { %85 = vmatpush.msra.mxu1 %v61_v9  ;;  %v131_v10 = vld [vmem:[%s235_s2] ss:$0 sm:$0xff]  ;;  %s163_s2 = smov [#allocation2]  }
   0xa   :  { %50 = vmatpush.msra.mxu0 %v25_v4  ;;  %v132_v15 = vld [vmem:[%s237_s4] ss:$0 sm:$0xff]  ;;  %s116_s3 = sshll.u32 %s163_s2, 4  ;;  %s118_s4 = sshll.u32 %s238_s5, 4  ;;  %s117_s3 = int_to_ptr.vmem [resolvable:$true] %s116_s3  ;;  %s119_s4 = int_to_ptr.hbm [resolvable:$true] %s118_s4 }
   0xc   :  { %51 = vmatpush.msra.mxu0 %v24_v5 }
   0xe   :  { %52 = vmatpush.msra.mxu0 %v23_v6 }
  0x10   :  { %53 = vmatpush.msra.mxu0 %v22_v7 }
  0x11   :  { %127 = vmatmul.msk.f32.vlgmr.msra.gmra.mxu0 %vm34_vm0, %v21_v8 }
  0x8e   :  { %v55_v11 = vpop.f32.mrf.mxu0 }
  0x8f   :  { %v56_v12 = vadd.f32 %v131_v10, %v55_v11 }
  0x91   :  { %v59_v13 = vmul.f32 0.1, %v56_v12  ;;  %vm58_vm1 = vcmp.gt.f32.partialorder %v56_v12, 0.0 }
  0x93   :  { %v60_v14 = vsel %vm58_vm1, %v56_v12, %v59_v13 }
  0x94   :  { %128 = vmatmul.msk.f32.vlgmr.msra.gmra.mxu1 %vm66_vm2, %v60_v14 }
 0x111   :  { %v87_v16 = vpop.f32.mrf.mxu1 }
 0x112   :  { %v88_v17 = vadd.f32 %v132_v15, %v87_v16 }
 0x114   :  { %v129_v18 = vmul.f32 -1.442695, %v88_v17 }
 0x116   :  { %133 = vpow2.f32 %v129_v18 }
 0x11c   :  { %v134_v19 = vpop.eup %133 }
 0x11d   :  { %v93_v20 = vadd.f32 1.0, %v134_v19 }
 0x11f   :  { %135 = vrcp.f32 %v93_v20  ;;  %v105_v24 = vand.u32 2147483648, %v93_v20  ;;  %v103_v26 = vand.u32 2147483647, %v93_v20  ;;  %vm99_vm4 = vweird.f32 %v93_v20 }
 0x121   :  { %v106_v28 = vor.u32 1.1754944e-38, %v105_v24  ;;  %vm104_vm7 = vcmp.eq.f32.partialorder %v103_v26, 8.507059e+37 }
 0x125   :  { %v136_v21 = vpop.eup %135 }
 0x126   :  { %v95_v22 = vmul.f32 %v136_v21, %v93_v20  ;;  %vm100_vm3 = vweird.f32 %v136_v21 }
 0x127   :  { %vm101_vm5 = vmor %vm99_vm4, %vm100_vm3 }
 0x128   :  { %v96_v23 = vsub.f32 1.0, %v95_v22 }
 0x12a   :  { %v97_v25 = vmul.f32 %v136_v21, %v96_v23 }
 0x12c   :  { %v98_v27 = vadd.f32 %v136_v21, %v97_v25 }
 0x12e   :  { %v102_v29 = vsel %vm101_vm5, %v136_v21, %v98_v27 }
 0x12f   :  { %v107_v30 = vsel %vm104_vm7, %v106_v28, %v102_v29 }
 0x130   :  { %110 = vst.msk [vmem:[#allocation2] sm:$0x3] %vm109_vm6, %v107_v30 }
 0x131   :  { %121 = dma.vmem_to_hbm [thread:$0]  %s117_s3, 32, %s119_s4, [#allocation3]  }
 0x132   :  { %161 = dma.done.wait [#allocation3], 32  }
 0x133   :  { %162 = vsyncadd [#allocation3], 4294967264 }
 0x134   :  { %126 = vsyncpa [#allocation3], 1 }

</bundles_post_ra>
